<compile_context>
chip_gen: v5e
topology: v5e:2x2
jax: 0.10.0
libtpu: 0.0.40
codegen_flags: <defaults>
</compile_context>

<pallas_src>
import functools

import jax
import jax.numpy as jnp
from jax.experimental import pallas as pl
from jax.experimental.pallas import tpu as pltpu

_LANE = 128
_SUBLANE = 8


def _round_up(x, m):
    return ((x + m - 1) // m) * m


def _pick_row_tile(B, block_b):
    """Row tile: big enough to amortize the ~0.35us per-grid-step overhead, but
    split into >=2 'parallel' tiles when the batch allows it (v7x has 2 TCs)."""
    if B >= 2 * block_b:
        return block_b
    half = -(-B // 2)
    if half >= 128:
        tb = _round_up(half, 128)
    else:
        tb = _round_up(half, _SUBLANE)
    tb = max(tb, _SUBLANE)
    return min(tb, _round_up(B, _SUBLANE))


@functools.lru_cache(maxsize=1)
def _vmem_capacity_bytes():
    try:
        return int(getattr(pltpu.get_tpu_info(), "vmem_capacity_bytes",
                           64 * 1024 * 1024))
    except Exception:
        return 64 * 1024 * 1024  # conservative: v7x per-TC physical VMEM


def _head_kernel(x_ref, w1_ref, b1_ref, w2_ref, b2_ref, o_ref):
    # Cast the row tile to the compute dtype here (under the pipeline), not in
    # the wrapper: avoids an extra full HBM read+write pass over x.
    x = x_ref[...].astype(w1_ref.dtype)
    # dense: x @ W1, W1 already in (in, out) layout -> standard (1,0) contraction (MXU).
    h = jnp.dot(x, w1_ref[...], preferred_element_type=jnp.float32)
    h = jnp.tanh(h + b1_ref[...])                 # bias + tanh in f32 (VPU/EUP)
    # Dropout: eval mode -> identity.
    # TODO(synk): training-mode dropout (pltpu.prng_random_bits mask/scale) not needed for eval parity.
    # out_proj: h @ W2, W2 is (H, C_pad), zero-padded on 'out' for lane density.
    out = jnp.dot(h.astype(w2_ref.dtype), w2_ref[...],
                  preferred_element_type=jnp.float32)
    o_ref[...] = (out + b2_ref[...]).astype(o_ref.dtype)


def prepare_head_params(w_dense, b_dense, w_out, b_out, *,
                        compute_dtype=jnp.bfloat16):
    """One-time weight prep (do at model-load time, not per call):
    PyTorch (out, in) -> (in, out) transpose, cast to compute dtype, lane-pad classes.

    Returns (w1, b1, w2, b2, num_class)."""
    H = w_dense.shape[0]
    C = w_out.shape[0]
    C_pad = _round_up(C, _LANE)
    w1 = jnp.asarray(w_dense).T.astype(compute_dtype)                      # (H, H)
    w2 = jnp.pad(jnp.asarray(w_out),
                 ((0, C_pad - C), (0, 0))).T.astype(compute_dtype)         # (H, C_pad)
    b1 = jnp.asarray(b_dense).astype(jnp.float32).reshape(1, H)
    b2 = jnp.pad(jnp.asarray(b_out), (0, C_pad - C)).astype(jnp.float32).reshape(1, C_pad)
    return w1, b1, w2, b2, C


@functools.partial(jax.jit, static_argnames=("num_class", "block_b", "out_dtype"))
def hubert_head_forward(x, w1, b1, w2, b2, *, num_class, block_b=512,
                        out_dtype=None):
    """x: (B, H) float; w1: (H, H) (in,out); b1: (1, H) f32; w2: (H, C_pad);
    b2: (1, C_pad) f32. Returns (B, num_class) logits."""
    B, H = x.shape
    C_pad = w2.shape[1]
    out_dtype = x.dtype if out_dtype is None else jnp.dtype(out_dtype)

    TB = _pick_row_tile(B, block_b)
    grid = (pl.cdiv(B, TB),)

    x_bytes = jnp.dtype(x.dtype).itemsize
    w_bytes = jnp.dtype(w1.dtype).itemsize
    o_bytes = jnp.dtype(out_dtype).itemsize

    # Per-step live VMEM: double-buffered x/out tiles, resident weights/biases,
    # plus the f32 tanh intermediate and its compute-dtype copy.
    vmem_bytes = (
        2 * TB * H * x_bytes            # x tiles (double-buffered, native dtype)
        + TB * H * w_bytes              # in-kernel compute-dtype copy of x tile
        + TB * H * 4                    # f32 h intermediate
        + TB * H * w_bytes              # compute-dtype copy of h
        + TB * C_pad * 4                # f32 out before final cast
        + H * H * w_bytes               # W1 (VMEM-resident)
        + H * C_pad * w_bytes           # W2 (VMEM-resident)
        + (H + C_pad) * 4               # biases (resident, f32)
        + 2 * TB * C_pad * o_bytes      # out tiles (double-buffered)
    )
    vmem_cap = int(0.75 * _vmem_capacity_bytes())   # keep headroom (esp. v7x 64 MiB)
    vmem_limit = int(min(max(2 * vmem_bytes, 32 * 1024 * 1024), vmem_cap))

    cost = pl.CostEstimate(
        flops=2 * B * H * H + 2 * B * H * C_pad,
        transcendentals=B * H,
        bytes_accessed=(B * H * x_bytes + B * C_pad * o_bytes
                        + H * H * w_bytes + H * C_pad * w_bytes
                        + (H + C_pad) * 4),
    )

    out = pl.pallas_call(
        _head_kernel,
        out_shape=jax.ShapeDtypeStruct((B, C_pad), out_dtype),
        grid=grid,
        in_specs=[
            pl.BlockSpec((TB, H), lambda i: (i, 0)),       # x: row-tiled
            pl.BlockSpec((H, H), lambda i: (0, 0)),        # W1: VMEM-resident
            pl.BlockSpec((1, H), lambda i: (0, 0)),        # b1: resident
            pl.BlockSpec((H, C_pad), lambda i: (0, 0)),    # W2: resident
            pl.BlockSpec((1, C_pad), lambda i: (0, 0)),    # b2: resident
        ],
        out_specs=pl.BlockSpec((TB, C_pad), lambda i: (i, 0)),
        compiler_params=pltpu.CompilerParams(
            dimension_semantics=("parallel",),
            vmem_limit_bytes=vmem_limit,
        ),
        cost_estimate=cost,
    )(x, w1, b1, w2, b2)

    return out[:, :num_class]


def hubert_classification_head(x, w_dense, b_dense, w_out, b_out, *,
                               compute_dtype=jnp.bfloat16, block_b=512,
                               out_dtype=None):
    """Convenience path taking PyTorch-layout weights. In a serving loop, call
    prepare_head_params() once at load time and reuse the prepared arrays."""
    w1, b1, w2, b2, num_class = prepare_head_params(
        w_dense, b_dense, w_out, b_out, compute_dtype=compute_dtype)
    return hubert_head_forward(x, w1, b1, w2, b2, num_class=num_class,
                               block_b=block_b, out_dtype=out_dtype)


def _reference(x, w_dense, b_dense, w_out, b_out):
    h = jnp.tanh(x @ w_dense.T + b_dense)
    return h @ w_out.T + b_out


if __name__ == "__main__":
    key = jax.random.PRNGKey(0)
    batch, hidden, num_class = 8, 32, 4

    k_x, k_w1, k_b1, k_w2, k_b2 = jax.random.split(key, 5)
    x = jax.random.normal(k_x, (batch, hidden), dtype=jnp.float32)
    # Deterministic "init" mimicking nn.Linear: dense (H,H)+(H,), out_proj (C,H)+(C,)
    w_dense = jax.random.normal(k_w1, (hidden, hidden), dtype=jnp.float32) * 0.05
    b_dense = jax.random.normal(k_b1, (hidden,), dtype=jnp.float32) * 0.05
    w_out = jax.random.normal(k_w2, (num_class, hidden), dtype=jnp.float32) * 0.05
    b_out = jax.random.normal(k_b2, (num_class,), dtype=jnp.float32) * 0.05

    ref = _reference(x, w_dense, b_dense, w_out, b_out)

    # f32 compute path: tight parity with the PyTorch-equivalent reference.
    out_f32 = jax.block_until_ready(
        hubert_classification_head(x, w_dense, b_dense, w_out, b_out,
                                   compute_dtype=jnp.float32))
    assert out_f32.shape == (batch, num_class)
    assert jnp.allclose(out_f32, ref, atol=1e-4, rtol=1e-4), "f32 mismatch vs reference"

    # Default bf16 MXU path (f32 accumulate / bias / tanh): looser tolerance.
    out_bf16 = jax.block_until_ready(
        hubert_classification_head(x, w_dense, b_dense, w_out, b_out))
    assert out_bf16.shape == (batch, num_class)
    assert jnp.allclose(out_bf16, ref, atol=3e-2, rtol=3e-2), "bf16 mismatch vs reference"

    print("KERNEL_OK")
</pallas_src>

<mosaic_0001>
module attributes {stable_mosaic.version = 11 : i64} {
  func.func @_head_kernel(%arg0: i32, %arg1: memref<8x32xf32, #tpu.memory_space<vmem>>, %arg2: memref<32x32xf32, #tpu.memory_space<vmem>>, %arg3: memref<1x32xf32, #tpu.memory_space<vmem>>, %arg4: memref<32x128xf32, #tpu.memory_space<vmem>>, %arg5: memref<1x128xf32, #tpu.memory_space<vmem>>, %arg6: memref<8x128xf32, #tpu.memory_space<vmem>>) attributes {dimension_semantics = [#tpu.dimension_semantics<parallel>], iteration_bounds = array<i64: 1>, scalar_prefetch = 0 : i64, scratch_operands = 0 : i64, tpu.core_type = #tpu.core_type<tc>, window_params = [{transform_indices = @transform_0, window_bounds = array<i64: 8, 32>}, {pipeline_mode = #tpu.pipeline_mode<synchronous>, transform_indices = @transform_1, window_bounds = array<i64: 32, 32>}, {pipeline_mode = #tpu.pipeline_mode<synchronous>, transform_indices = @transform_2, window_bounds = array<i64: 1, 32>}, {pipeline_mode = #tpu.pipeline_mode<synchronous>, transform_indices = @transform_3, window_bounds = array<i64: 32, 128>}, {pipeline_mode = #tpu.pipeline_mode<synchronous>, transform_indices = @transform_4, window_bounds = array<i64: 1, 128>}, {transform_indices = @transform_5, window_bounds = array<i64: 8, 128>}]} {
    %c0 = arith.constant 0 : index
    %c0_0 = arith.constant 0 : index
    %0 = vector.load %arg1[%c0, %c0_0] : memref<8x32xf32, #tpu.memory_space<vmem>>, vector<8x32xf32>
    %c0_1 = arith.constant 0 : index
    %c0_2 = arith.constant 0 : index
    %1 = vector.load %arg2[%c0_1, %c0_2] : memref<32x32xf32, #tpu.memory_space<vmem>>, vector<32x32xf32>
    %cst = arith.constant dense<0.000000e+00> : vector<8x32xf32>
    %2 = tpu.matmul %0, %1, %cst {dimension_numbers = #tpu.dot_dimension_numbers<[1], [0], [0], [1], [0, 0, 1, 1], [], []>} : vector<8x32xf32>, vector<32x32xf32>, vector<8x32xf32> -> vector<8x32xf32>
    %c0_3 = arith.constant 0 : index
    %c0_4 = arith.constant 0 : index
    %3 = vector.load %arg3[%c0_3, %c0_4] : memref<1x32xf32, #tpu.memory_space<vmem>>, vector<1x32xf32>
    %4 = vector.broadcast %3 : vector<1x32xf32> to vector<8x32xf32>
    %5 = arith.addf %2, %4 : vector<8x32xf32>
    %6 = math.tanh %5 : vector<8x32xf32>
    %c0_5 = arith.constant 0 : index
    %c0_6 = arith.constant 0 : index
    %7 = vector.load %arg4[%c0_5, %c0_6] : memref<32x128xf32, #tpu.memory_space<vmem>>, vector<32x128xf32>
    %cst_7 = arith.constant dense<0.000000e+00> : vector<8x128xf32>
    %8 = tpu.matmul %6, %7, %cst_7 {dimension_numbers = #tpu.dot_dimension_numbers<[1], [0], [0], [1], [0, 0, 1, 1], [], []>} : vector<8x32xf32>, vector<32x128xf32>, vector<8x128xf32> -> vector<8x128xf32>
    %c0_8 = arith.constant 0 : index
    %c0_9 = arith.constant 0 : index
    %9 = vector.load %arg5[%c0_8, %c0_9] : memref<1x128xf32, #tpu.memory_space<vmem>>, vector<1x128xf32>
    %10 = vector.broadcast %9 : vector<1x128xf32> to vector<8x128xf32>
    %11 = arith.addf %8, %10 : vector<8x128xf32>
    %c0_10 = arith.constant 0 : index
    %c0_11 = arith.constant 0 : index
    %12 = vector.load %arg6[%c0_10, %c0_11] : memref<8x128xf32, #tpu.memory_space<vmem>>, vector<8x128xf32>
    tpu.vector_store %arg6[%c0_10, %c0_11], %11 {strides = array<i32>} : memref<8x128xf32, #tpu.memory_space<vmem>>, vector<8x128xf32>,
    return
  }
  func.func @transform_0(%arg0: i32) -> (i32, i32) {
    %c0_i32 = arith.constant 0 : i32
    %c0_i32_0 = arith.constant 0 : i32
    return %arg0, %c0_i32 : i32, i32
  }
  func.func @transform_1(%arg0: i32) -> (i32, i32) {
    %c0_i32 = arith.constant 0 : i32
    %c0_i32_0 = arith.constant 0 : i32
    %c0_i32_1 = arith.constant 0 : i32
    return %c0_i32, %c0_i32_0 : i32, i32
  }
  func.func @transform_2(%arg0: i32) -> (i32, i32) {
    %c0_i32 = arith.constant 0 : i32
    %c0_i32_0 = arith.constant 0 : i32
    %c0_i32_1 = arith.constant 0 : i32
    return %c0_i32, %c0_i32_0 : i32, i32
  }
  func.func @transform_3(%arg0: i32) -> (i32, i32) {
    %c0_i32 = arith.constant 0 : i32
    %c0_i32_0 = arith.constant 0 : i32
    %c0_i32_1 = arith.constant 0 : i32
    return %c0_i32, %c0_i32_0 : i32, i32
  }
  func.func @transform_4(%arg0: i32) -> (i32, i32) {
    %c0_i32 = arith.constant 0 : i32
    %c0_i32_0 = arith.constant 0 : i32
    %c0_i32_1 = arith.constant 0 : i32
    return %c0_i32, %c0_i32_0 : i32, i32
  }
  func.func @transform_5(%arg0: i32) -> (i32, i32) {
    %c0_i32 = arith.constant 0 : i32
    %c0_i32_0 = arith.constant 0 : i32
    return %arg0, %c0_i32 : i32, i32
  }
}

</mosaic_0001>

<bundles_post_ra>
// kernel: hubert_head_forward.1
= control target key start
LH: loop header
LB: loop body
LE: loop exit
PB: predicated region body
PF: predicated region fallthrough
CT: control target
= control target key end

     0   :  { %10 = vsyncpa [#allocation3], 0  ;;  %s279_s0 = inlined_call_operand.hbm [shape: f32[8,32], index: 0, kind: input, shape index: {}]   ;;  %s280_s1 = inlined_call_operand.hbm [shape: f32[32,32], index: 1, kind: input, shape index: {}]   ;;  %s281_s2 = inlined_call_operand.vmem [shape: f32[1,32], index: 2, kind: input, shape index: {}]   ;;  %s282_s3 = inlined_call_operand.hbm [shape: f32[32,128], index: 3, kind: input, shape index: {}]   ;;  %s283_s4 = inlined_call_operand.vmem [shape: f32[1,128], index: 4, kind: input, shape index: {}]   ;;  %s284_s5 = inlined_call_operand.vmem [shape: f32[8,128], index: 5, kind: output, shape index: {}]  }
   0x1   :  { %11 = vsyncpa [#allocation5], 0  ;;  %s27_s20 = sshll.u32 %s280_s1, 4  ;;  %s224_s21 = smov [#allocation4]   ;;  %s28_s20 = int_to_ptr.hbm [resolvable:$true] %s27_s20 }
   0x2   :  { %s29_s22 = sshll.u32 %s224_s21, 4  ;;  %s17_s25 = sshll.u32 %s279_s0, 4  ;;  %s30_s22 = int_to_ptr.vmem [resolvable:$true] %s29_s22  ;;  %s18_s25 = int_to_ptr.hbm [resolvable:$true] %s17_s25 }
   0x3   :  { %s225_s26 = smov 128   ;;  %s226_s27 = smov 8  }
   0x4   :  { %35 = dma.hbm_to_vmem [thread:$0]  %s28_s20, 512, %s30_s22, [#allocation5], %s225_s26, %s225_s26, %s226_s27  }
   0x5   :  { %s227_s28 = smov [#allocation2]   ;;  %s42_s7 = sshll.u32 %s282_s3, 4  ;;  %s43_s7 = int_to_ptr.hbm [resolvable:$true] %s42_s7 }
   0x6   :  { %s19_s29 = sshll.u32 %s227_s28, 4  ;;  %s228_s1 = smov [#allocation6]   ;;  %s20_s29 = int_to_ptr.vmem [resolvable:$true] %s19_s29 }
   0x7   :  { %22 = dma.hbm_to_vmem [thread:$0]  %s18_s25, 128, %s20_s29, [#allocation3]  }
   0x8   :  { %s44_s8 = sshll.u32 %s228_s1, 4  ;;  %s45_s8 = int_to_ptr.vmem [resolvable:$true] %s44_s8 }
   0x9   :  { %50 = dma.hbm_to_vmem [thread:$0]  %s43_s7, 512, %s45_s8, [#allocation5], %s225_s26, %s225_s26, %s226_s27  }
   0xa   :  { %220 = dma.done.wait [#allocation3], 128  }
   0xb   :  { %221 = vsyncadd [#allocation3], 4294967168 }
   0xc   :  { %222 = dma.done.wait [#allocation5], 1024  }
   0xd   :  { %223 = vsyncadd [#allocation5], 4294966272  ;;  %v69_v0 = vld [vmem:[#allocation4 + $0x18] sm:$0xff]  ;;  %v68_v1 = vld [vmem:[#allocation4 + $0x10] sm:$0xff]  ;;  %vm74_vm0 = vcmask 261120  }
   0xe   :  { %90 = vmatpush.msra.mxu0 %v69_v0  ;;  %v67_v2 = vld [vmem:[#allocation4 + $0x8] sm:$0xff]  ;;  %v66_v3 = vld [vmem:[#allocation4] sm:$0xff]  ;;  %v65_v4 = vld [vmem:[#allocation2] sm:$0xff] }
   0xf   :  { %v102_v5 = vld [vmem:[#allocation6 + $0x18] sm:$0xff]  ;;  %v101_v6 = vld [vmem:[#allocation6 + $0x10] sm:$0xff]  ;;  %v100_v7 = vld [vmem:[#allocation6 + $0x8] sm:$0xff] }
  0x10   :  { %91 = vmatpush.msra.mxu0 %v68_v1  ;;  %122 = vmatpush.msra.mxu1 %v102_v5  ;;  %v99_v8 = vld [vmem:[#allocation6] sm:$0xff]  ;;  %v144_v9 = vld [vmem:[%s281_s2] ss:$0 sm:$0xff] }
  0x11   :  { %v145_v13 = vld [vmem:[%s283_s4] ss:$0 sm:$0xff] }
  0x12   :  { %92 = vmatpush.msra.mxu0 %v67_v2  ;;  %123 = vmatpush.msra.mxu1 %v101_v6 }
  0x14   :  { %93 = vmatpush.msra.mxu0 %v66_v3  ;;  %124 = vmatpush.msra.mxu1 %v100_v7 }
  0x15   :  { %137 = vmatmul.msk.f32.vlgmr.msra.gmra.mxu0 %vm74_vm0, %v65_v4 }
  0x16   :  { %125 = vmatpush.msra.mxu1 %v99_v8 }
  0x92   :  { %v95_v10 = vpop.f32.mrf.mxu0 }
  0x93   :  { %v96_v11 = vadd.f32 %v144_v9, %v95_v10 }
  0x95   :  { %146 = vtanh.f32 %v96_v11 }
  0x9b   :  { %v147_v12 = vpop.eup %146 }
  0x9c   :  { %138 = vmatmul.msk.f32.vlgmr.msra.gmra.mxu1 %vm74_vm0, %v147_v12 }
 0x119   :  { %v127_v14 = vpop.f32.mrf.mxu1 }
 0x11a   :  { %v128_v15 = vadd.f32 %v145_v13, %v127_v14 }
 0x11c   :  { %130 = vst [vmem:[%s284_s5] sm:$0xff] %v128_v15 }
 0x11d   :  { %135 = vsyncpa [#allocation3], 1 }
 0x11e   :  { %136 = vsyncpa [#allocation5], 1 }

</bundles_post_ra>
